<compile_context>
chip_gen: v6e
topology: v6e:2x2x1
jax: 0.10.0
libtpu: 0.0.40
codegen_flags: <defaults>
</compile_context>

<pallas_src>
import functools

import jax
import jax.numpy as jnp
import numpy as np
from jax.experimental import pallas as pl
from jax.experimental.pallas import tpu as pltpu

LANE = 128
TM_TARGET = 256   # row tile of A_hat / outputs
TK_TARGET = 512   # reduction (K) tile of A_hat


def _round_up(x, m):
    return (x + m - 1) // m * m


def _choose_tiling(n):
    """Padded node count plus (row tile, K tile) for the N x N aggregations."""
    n_min = _round_up(max(n, LANE), LANE)          # lane-dense even for tiny graphs
    if n_min >= TK_TARGET:
        n_pad = _round_up(n, TK_TARGET)            # TK_TARGET is a multiple of TM_TARGET
        return n_pad, TM_TARGET, TK_TARGET
    n_pad = n_min
    tk = n_pad                                     # single K step (full extent)
    if n_pad <= TM_TARGET:
        tm = n_pad
    elif n_pad % TM_TARGET == 0:
        tm = TM_TARGET
    else:
        tm = LANE                                  # 128 divides any lane-padded n
    return n_pad, tm, tk


def _pad2d(x, rows, cols, dtype):
    r, c = x.shape
    return jnp.pad(x, ((0, rows - r), (0, cols - c))).astype(dtype)


# ---------------------------------------------------------------------------
# Kernels
# ---------------------------------------------------------------------------
def feat_transform_kernel(x_ref, w_ref, o_ref):
    """o = X_tile @ W1  (cheap lane-dense transform; W1 stays resident)."""
    o_ref[...] = jnp.dot(x_ref[...], w_ref[...],
                         preferred_element_type=jnp.float32).astype(o_ref.dtype)


def layer1_aggregate_kernel(a_ref, xw_ref, b1_ref, w2_ref, h1_ref, p2_ref):
    """Layer-1 aggregation with fused layer-2 feature transform.

        h1  += A_tile @ XW1[k-slab]       (f32 accumulation directly in h1_ref)
        h1  += b1                         (finalize; pre-ReLU, == self.h_)
        p2   = relu(h1) @ W2              (finalize; operand for layer 2)
    """
    k = pl.program_id(1)
    tk = a_ref.shape[1]                    # static block size

    @pl.when(k == 0)
    def _init():
        h1_ref[...] = jnp.zeros_like(h1_ref)

    k_off = pl.multiple_of(k * tk, tk)
    h1_ref[...] += jnp.dot(a_ref[...], xw_ref[pl.ds(k_off, tk), :],
                           preferred_element_type=jnp.float32)

    @pl.when(k == pl.num_programs(1) - 1)
    def _finalize():
        h1 = h1_ref[...] + b1_ref[...]
        h1_ref[...] = h1
        h1r = jnp.maximum(h1, 0.0).astype(jnp.bfloat16)   # ReLU in f32, cast for MXU
        p2_ref[...] = jnp.dot(h1r, w2_ref[...],
                              preferred_element_type=jnp.float32
                              ).astype(p2_ref.dtype)


def aggregate_bias_kernel(a_ref, p_ref, b_ref, o_ref):
    """o += A_tile @ P[k-slab]; o += b at finalize (accumulate in the output)."""
    k = pl.program_id(1)
    tk = a_ref.shape[1]

    @pl.when(k == 0)
    def _init():
        o_ref[...] = jnp.zeros_like(o_ref)

    k_off = pl.multiple_of(k * tk, tk)
    o_ref[...] += jnp.dot(a_ref[...], p_ref[pl.ds(k_off, tk), :],
                          preferred_element_type=jnp.float32)

    @pl.when(k == pl.num_programs(1) - 1)
    def _finalize():
        o_ref[...] += b_ref[...]


# ---------------------------------------------------------------------------
# Wrapper
# ---------------------------------------------------------------------------
def gcn_forward(adj_norm, feat, w1, b1, w2, b2):
    n, in_feats = feat.shape
    h_feats = w1.shape[1]
    num_classes = w2.shape[1]

    n_pad, tm, tk = _choose_tiling(n)
    in_pad = _round_up(in_feats, LANE)
    h_pad = _round_up(h_feats, LANE)
    c_pad = _round_up(num_classes, LANE)
    n_row = n_pad // tm
    n_k = n_pad // tk

    # bf16 MXU operands (zero-padded); all accumulation is f32 inside kernels.
    adj_b = _pad2d(adj_norm, n_pad, n_pad, jnp.bfloat16)
    x_b = _pad2d(feat, n_pad, in_pad, jnp.bfloat16)
    w1_b = _pad2d(w1, in_pad, h_pad, jnp.bfloat16)
    w2_b = _pad2d(w2, h_pad, c_pad, jnp.bfloat16)
    b1_p = _pad2d(b1.reshape(1, -1), 1, h_pad, jnp.float32)
    b2_p = _pad2d(b2.reshape(1, -1), 1, c_pad, jnp.float32)

    # 48 MiB keeps the same config valid on v7x (64 MiB physical VMEM) while
    # still leaving room for the resident XW1/P2 slabs + double-buffered A tiles.
    params = functools.partial(pltpu.CompilerParams,
                               vmem_limit_bytes=48 * 1024 * 1024)

    def agg_cost(f_out):
        # A read once + resident operand read once + f32 output writeback.
        return pl.CostEstimate(
            flops=2 * n_pad * n_pad * f_out,
            transcendentals=0,
            bytes_accessed=n_pad * n_pad * 2 + n_pad * f_out * 2
                           + n_pad * f_out * 4)

    # (1) XW1 = X @ W1  -- O(N*in*h) lane-dense transform, row-tiled, W1 resident.
    xw1 = pl.pallas_call(
        feat_transform_kernel,
        out_shape=jax.ShapeDtypeStruct((n_pad, h_pad), jnp.bfloat16),
        grid=(n_row,),
        in_specs=[
            pl.BlockSpec((tm, in_pad), lambda i: (i, 0)),
            pl.BlockSpec((in_pad, h_pad), lambda i: (0, 0)),
        ],
        out_specs=pl.BlockSpec((tm, h_pad), lambda i: (i, 0)),
        compiler_params=params(dimension_semantics=("parallel",)),
        cost_estimate=pl.CostEstimate(
            flops=2 * n_pad * in_pad * h_pad,
            transcendentals=0,
            bytes_accessed=(n_pad * in_pad + in_pad * h_pad
                            + n_pad * h_pad) * 2),
    )(x_b, w1_b)

    # (2) h1 = A_hat @ XW1 + b1 ; P2 = relu(h1) @ W2  (fused finalize).
    #     XW1 / b1 / W2 are VMEM-resident (constant index_map); only the A_hat
    #     tile streams from HBM. h1_ref is the f32 accumulator (constant over k).
    h1_pad, p2 = pl.pallas_call(
        layer1_aggregate_kernel,
        out_shape=(jax.ShapeDtypeStruct((n_pad, h_pad), jnp.float32),
                   jax.ShapeDtypeStruct((n_pad, c_pad), jnp.bfloat16)),
        grid=(n_row, n_k),
        in_specs=[
            pl.BlockSpec((tm, tk), lambda i, k: (i, k)),         # A_hat (streamed)
            pl.BlockSpec((n_pad, h_pad), lambda i, k: (0, 0)),   # XW1 (resident)
            pl.BlockSpec((1, h_pad), lambda i, k: (0, 0)),       # b1  (resident)
            pl.BlockSpec((h_pad, c_pad), lambda i, k: (0, 0)),   # W2  (resident)
        ],
        out_specs=(pl.BlockSpec((tm, h_pad), lambda i, k: (i, 0)),
                   pl.BlockSpec((tm, c_pad), lambda i, k: (i, 0))),
        compiler_params=params(dimension_semantics=("parallel", "arbitrary")),
        cost_estimate=agg_cost(h_pad),
    )(adj_b, xw1, b1_p, w2_b)

    # (3) out = A_hat @ P2 + b2.  P2 / b2 resident, A_hat streamed, accumulate
    #     directly into the f32 output block.
    out_pad = pl.pallas_call(
        aggregate_bias_kernel,
        out_shape=jax.ShapeDtypeStruct((n_pad, c_pad), jnp.float32),
        grid=(n_row, n_k),
        in_specs=[
            pl.BlockSpec((tm, tk), lambda i, k: (i, k)),         # A_hat (streamed)
            pl.BlockSpec((n_pad, c_pad), lambda i, k: (0, 0)),   # P2 (resident)
            pl.BlockSpec((1, c_pad), lambda i, k: (0, 0)),       # b2 (resident)
        ],
        out_specs=pl.BlockSpec((tm, c_pad), lambda i, k: (i, 0)),
        compiler_params=params(dimension_semantics=("parallel", "arbitrary")),
        cost_estimate=agg_cost(c_pad),
    )(adj_b, p2, b2_p)

    h1 = h1_pad[:n, :h_feats]
    out = out_pad[:n, :num_classes]
    return h1, out


# ---------------------------------------------------------------------------
# Plain-JAX glue: graph normalization + parameter init
# ---------------------------------------------------------------------------
def build_normalized_adjacency(num_nodes, src, dst):
    """Dense A_hat = D_in^{-1/2} A^T D_out^{-1/2} (DGL GraphConv norm='both')."""
    a = jnp.zeros((num_nodes, num_nodes), jnp.float32)
    a = a.at[src, dst].add(1.0)                    # A[u, v] = 1 for edge u -> v
    out_deg = jnp.clip(a.sum(axis=1), 1.0, None)   # out-degree of source nodes
    in_deg = jnp.clip(a.sum(axis=0), 1.0, None)    # in-degree of destinations
    norm_src = out_deg ** -0.5
    norm_dst = in_deg ** -0.5
    return norm_dst[:, None] * a.T * norm_src[None, :]


def xavier_uniform(key, shape):
    fan_in, fan_out = shape
    limit = float(np.sqrt(6.0 / (fan_in + fan_out)))
    return jax.random.uniform(key, shape, jnp.float32, -limit, limit)


if __name__ == "__main__":
    num_nodes = 8
    in_feats = 16
    h_feats = 32
    num_classes = 4

    key = jax.random.PRNGKey(0)
    k_feat, k_w1, k_w2, k_src, k_dst = jax.random.split(key, 5)

    # Deterministic small random directed graph.
    num_edges = 20
    src = jax.random.randint(k_src, (num_edges,), 0, num_nodes)
    dst = jax.random.randint(k_dst, (num_edges,), 0, num_nodes)
    adj_norm = build_normalized_adjacency(num_nodes, src, dst)

    feat = jax.random.normal(k_feat, (num_nodes, in_feats), jnp.float32)

    # DGL GraphConv params: weight (in, out) xavier-uniform, bias zeros.
    w1 = xavier_uniform(k_w1, (in_feats, h_feats))
    b1 = jnp.zeros((h_feats,), jnp.float32)
    w2 = xavier_uniform(k_w2, (h_feats, num_classes))
    b2 = jnp.zeros((num_classes,), jnp.float32)

    h1, out = gcn_forward(adj_norm, feat, w1, b1, w2, b2)
    jax.block_until_ready((h1, out))

    # Reference in plain JAX.  Kernels use bf16 MXU operands with f32
    # accumulation, so compare against a reference computed from the same
    # bf16-rounded inputs (bf16 intermediates add a small extra error).
    adj_f = adj_norm.astype(jnp.bfloat16).astype(jnp.float32)
    feat_f = feat.astype(jnp.bfloat16).astype(jnp.float32)
    w1_f = w1.astype(jnp.bfloat16).astype(jnp.float32)
    w2_f = w2.astype(jnp.bfloat16).astype(jnp.float32)
    h1_ref = adj_f @ (feat_f @ w1_f) + b1[None, :]
    out_ref = adj_f @ (jnp.maximum(h1_ref, 0.0) @ w2_f) + b2[None, :]

    np.testing.assert_allclose(np.asarray(h1), np.asarray(h1_ref),
                               rtol=3e-2, atol=3e-2)
    np.testing.assert_allclose(np.asarray(out), np.asarray(out_ref),
                               rtol=3e-2, atol=3e-2)

    print("KERNEL_OK")
</pallas_src>

<mosaic_0001>
module attributes {stable_mosaic.version = 11 : i64} {
  func.func @feat_transform_kernel(%arg0: i32, %arg1: memref<128x128xbf16, #tpu.memory_space<vmem>>, %arg2: memref<128x128xbf16, #tpu.memory_space<vmem>>, %arg3: memref<128x128xbf16, #tpu.memory_space<vmem>>) attributes {dimension_semantics = [#tpu.dimension_semantics<parallel>], iteration_bounds = array<i64: 1>, scalar_prefetch = 0 : i64, scratch_operands = 0 : i64, tpu.core_type = #tpu.core_type<tc>, window_params = [{transform_indices = @transform_0, window_bounds = array<i64: 128, 128>}, {pipeline_mode = #tpu.pipeline_mode<synchronous>, transform_indices = @transform_1, window_bounds = array<i64: 128, 128>}, {transform_indices = @transform_2, window_bounds = array<i64: 128, 128>}]} {
    %c0 = arith.constant 0 : index
    %c0_0 = arith.constant 0 : index
    %0 = vector.load %arg1[%c0, %c0_0] : memref<128x128xbf16, #tpu.memory_space<vmem>>, vector<128x128xbf16>
    %c0_1 = arith.constant 0 : index
    %c0_2 = arith.constant 0 : index
    %1 = vector.load %arg2[%c0_1, %c0_2] : memref<128x128xbf16, #tpu.memory_space<vmem>>, vector<128x128xbf16>
    %cst = arith.constant dense<0.000000e+00> : vector<128x128xf32>
    %2 = tpu.matmul %0, %1, %cst {dimension_numbers = #tpu.dot_dimension_numbers<[1], [0], [0], [1], [0, 0, 1, 1], [], []>} : vector<128x128xbf16>, vector<128x128xbf16>, vector<128x128xf32> -> vector<128x128xf32>
    %3 = arith.truncf %2 : vector<128x128xf32> to vector<128x128xbf16>
    %c0_3 = arith.constant 0 : index
    %c0_4 = arith.constant 0 : index
    %4 = vector.load %arg3[%c0_3, %c0_4] : memref<128x128xbf16, #tpu.memory_space<vmem>>, vector<128x128xbf16>
    tpu.vector_store %arg3[%c0_3, %c0_4], %3 {strides = array<i32>} : memref<128x128xbf16, #tpu.memory_space<vmem>>, vector<128x128xbf16>,
    return
  }
  func.func @transform_0(%arg0: i32) -> (i32, i32) {
    %c0_i32 = arith.constant 0 : i32
    %c0_i32_0 = arith.constant 0 : i32
    return %arg0, %c0_i32 : i32, i32
  }
  func.func @transform_1(%arg0: i32) -> (i32, i32) {
    %c0_i32 = arith.constant 0 : i32
    %c0_i32_0 = arith.constant 0 : i32
    %c0_i32_1 = arith.constant 0 : i32
    return %c0_i32, %c0_i32_0 : i32, i32
  }
  func.func @transform_2(%arg0: i32) -> (i32, i32) {
    %c0_i32 = arith.constant 0 : i32
    %c0_i32_0 = arith.constant 0 : i32
    return %arg0, %c0_i32 : i32, i32
  }
}

</mosaic_0001>

<bundles_post_ra>
// kernel: tpu_custom_call.1
= control target key start
LH: loop header
LB: loop body
LE: loop exit
PB: predicated region body
PF: predicated region fallthrough
CT: control target
= control target key end

     0   :  { %7 = vsyncpa [#allocation3], 0  ;;  %s648_s0 = inlined_call_operand.hbm [shape: bf16[128,128], index: 0, kind: input, shape index: {}]   ;;  %s649_s1 = inlined_call_operand.hbm [shape: bf16[128,128], index: 1, kind: input, shape index: {}]   ;;  %s650_s2 = inlined_call_operand.hbm [shape: bf16[128,128], index: 2, kind: output, shape index: {}]  }
   0x1   :  { %8 = vsyncpa [#allocation6], 0 }
   0x2   :  { %9 = vsyncpa [#allocation4], 0  ;;  %s610_s9 = smov [#allocation2]  }
   0x3   :  { %s15_s10 = sshll.u32 %s610_s9, 4  ;;  %s16_s10 = int_to_ptr.vmem [resolvable:$true] %s15_s10 }
   0x4   :  { %s552_s11 = scalar_lea.vmem %s16_s10, 1024  ;;  %p557_p1 = scmp.lt.s32.totalorder %s16_s10, %s16_s10 }
   0x5   :  { %p553_p0 = scmp.ne.s32.totalorder %s16_s10, %s552_s11  ;;  %p558_p2 = scmp.lt.s32.totalorder %s552_s11, %s552_s11 }
   0x7   :  { %p559_p3 = por %p558_p2, %p557_p1 }
   0x9   :  { %p560_p4 = pnand %p559_p3, %p553_p0 }
   0xb   :  { %563 = shalt.err (!%p560_p4)
}
   0xc   :  { %s611_s12 = smov 64   ;;  %s612_s13 = smov 4  }
   0xd   :  { %21 = dma.hbm_to_vmem [thread:$0]  %s648_s0, 1024, %s16_s10, [#allocation3], %s611_s12, %s611_s12, %s612_s13  }
   0xe   :  { %s613_s16 = smov [#allocation5]  }
   0xf   :  { %s27_s17 = sshll.u32 %s613_s16, 4  ;;  %s28_s17 = int_to_ptr.vmem [resolvable:$true] %s27_s17 }
  0x10   :  { %s572_s18 = scalar_lea.vmem %s28_s17, 1024  ;;  %p577_p6 = scmp.lt.s32.totalorder %s28_s17, %s28_s17 }
  0x11   :  { %p573_p5 = scmp.ne.s32.totalorder %s28_s17, %s572_s18  ;;  %p578_p7 = scmp.lt.s32.totalorder %s572_s18, %s572_s18 }
  0x13   :  { %p579_p8 = por %p578_p7, %p577_p6 }
  0x15   :  { %p580_p9 = pnand %p579_p8, %p573_p5 }
  0x17   :  { %583 = shalt.err (!%p580_p9)
}
  0x18   :  { %33 = dma.hbm_to_vmem [thread:$0]  %s649_s1, 1024, %s28_s17, [#allocation6], %s611_s12, %s611_s12, %s612_s13  }
  0x19   :  { %604 = dma.done.wait [#allocation3], 1024  }
  0x1a   :  { %605 = vsyncadd [#allocation3], 4294966272 }
  0x1b   :  { %606 = dma.done.wait [#allocation6], 1024  }
  0x1c   :  { %607 = vsyncadd [#allocation6], 4294966272  ;;  %v528_v0 = vld [vmem:[#allocation5 + $0x38] sm:$0xff]   ;;  %v529_v1 = vld [vmem:[#allocation5 + $0x30] sm:$0xff]   ;;  %s614_s0 = smov [#allocation7]  }
  0x1d   :  { %475 = vmatprep.subr.bf16.mxu0 %v528_v0  ;;  %507 = vmatprep.subr.bf16.mxu1 %v528_v0  ;;  %v530_v2 = vld [vmem:[#allocation5 + $0x28] sm:$0xff]   ;;  %v531_v3 = vld [vmem:[#allocation5 + $0x20] sm:$0xff]   ;;  %v532_v6 = vld [vmem:[#allocation5 + $0x18] sm:$0xff]   ;;  %s351_s1 = sshll.u32 %s614_s0, 4  ;;  %s352_s1 = int_to_ptr.vmem [resolvable:$true] %s351_s1 }
  0x1e   :  { %476 = vmatpush3.bf16.msra.mxu0 %v528_v0  ;;  %515 = vmatpush3.bf16.msra.mxu1 %v528_v0  ;;  %v536_v4 = vld [vmem:[#allocation2] sm:$0xff]   ;;  %v533_v7 = vld [vmem:[#allocation5 + $0x10] sm:$0xff]   ;;  %v534_v8 = vld [vmem:[#allocation5 + $0x8] sm:$0xff]   ;;  %s584_s21 = scalar_lea.vmem %s352_s1, 1024  ;;  %p589_p11 = scmp.lt.s32.totalorder %s352_s1, %s352_s1 }
  0x1f   :  { %477 = vmatprep.subr.bf16.mxu0 %v529_v1  ;;  %508 = vmatprep.subr.bf16.mxu1 %v529_v1  ;;  %v537_v5 = vld [vmem:[#allocation2 + $0x20] sm:$0xff]   ;;  %v538_v10 = vld [vmem:[#allocation2 + $0x8] sm:$0xff]   ;;  %v540_v12 = vld [vmem:[#allocation2 + $0x10] sm:$0xff]   ;;  %p585_p10 = scmp.ne.s32.totalorder %s352_s1, %s584_s21  ;;  %p590_p12 = scmp.lt.s32.totalorder %s584_s21, %s584_s21 }
  0x20   :  { %491 = vmatprep.mubr.bf16.mxu0 %v536_v4  ;;  %499 = vmatprep.mubr.bf16.mxu1 %v537_v5  ;;  %v535_v9 = vld [vmem:[#allocation5] sm:$0xff]   ;;  %v539_v11 = vld [vmem:[#allocation2 + $0x28] sm:$0xff]   ;;  %v541_v13 = vld [vmem:[#allocation2 + $0x30] sm:$0xff]  }
  0x21   :  { %v542_v14 = vld [vmem:[#allocation2 + $0x18] sm:$0xff]   ;;  %p591_p13 = por %p590_p12, %p589_p11 }
  0x22   :  { %478 = vmatpush3.bf16.msra.mxu0 %v529_v1  ;;  %516 = vmatpush3.bf16.msra.mxu1 %v529_v1  ;;  %v543_v15 = vld [vmem:[#allocation2 + $0x38] sm:$0xff]  }
  0x23   :  { %479 = vmatprep.subr.bf16.mxu0 %v530_v2  ;;  %509 = vmatprep.subr.bf16.mxu1 %v530_v2  ;;  %p592_p0 = pnand %p591_p13, %p585_p10 }
  0x26   :  { %480 = vmatpush3.bf16.msra.mxu0 %v530_v2  ;;  %517 = vmatpush3.bf16.msra.mxu1 %v530_v2 }
  0x27   :  { %481 = vmatprep.subr.bf16.mxu0 %v531_v3  ;;  %510 = vmatprep.subr.bf16.mxu1 %v531_v3 }
  0x2a   :  { %482 = vmatpush3.bf16.msra.mxu0 %v531_v3  ;;  %518 = vmatpush3.bf16.msra.mxu1 %v531_v3 }
  0x2b   :  { %483 = vmatprep.subr.bf16.mxu0 %v532_v6  ;;  %511 = vmatprep.subr.bf16.mxu1 %v532_v6 }
  0x2e   :  { %484 = vmatpush3.bf16.msra.mxu0 %v532_v6  ;;  %519 = vmatpush3.bf16.msra.mxu1 %v532_v6 }
  0x2f   :  { %485 = vmatprep.subr.bf16.mxu0 %v533_v7  ;;  %512 = vmatprep.subr.bf16.mxu1 %v533_v7 }
  0x32   :  { %486 = vmatpush3.bf16.msra.mxu0 %v533_v7  ;;  %520 = vmatpush3.bf16.msra.mxu1 %v533_v7 }
  0x33   :  { %487 = vmatprep.subr.bf16.mxu0 %v534_v8  ;;  %513 = vmatprep.subr.bf16.mxu1 %v534_v8 }
  0x36   :  { %488 = vmatpush3.bf16.msra.mxu0 %v534_v8  ;;  %521 = vmatpush3.bf16.msra.mxu1 %v534_v8 }
  0x37   :  { %489 = vmatprep.subr.bf16.mxu0 %v535_v9  ;;  %514 = vmatprep.subr.bf16.mxu1 %v535_v9 }
  0x3a   :  { %490 = vmatpush3.bf16.msra.mxu0 %v535_v9  ;;  %522 = vmatpush3.bf16.msra.mxu1 %v535_v9 }
  0x3d   :  { %492 = vmatmul.mubr.bf16.vlgmr.msra.gmra.mxu0 %v538_v10  ;;  %500 = vmatmul.mubr.bf16.vlgmr.msra.gmra.mxu1 %v539_v11 }
  0x3e   :  { %495 = vmatprep.mubr.bf16.mxu0 %v540_v12  ;;  %503 = vmatprep.mubr.bf16.mxu1 %v541_v13 }
  0x45   :  { %496 = vmatmul.mubr.bf16.gmra.mxu0 %v542_v14  ;;  %504 = vmatmul.mubr.bf16.gmra.mxu1 %v543_v15 }
  0xfd   :  { %v493_v16 = vpop.f32.mrf.mxu0  ;;  %v501_v17 = vpop.f32.mrf.mxu1 }
  0xff   :  { %v203_v18 = vpop.f32.mrf.mxu0  ;;  %v235_v19 = vpop.f32.mrf.mxu1 }
 0x101   :  { %v494_v20 = vpop.f32.mrf.mxu0  ;;  %v502_v21 = vpop.f32.mrf.mxu1 }
 0x102   :  { %v420_v22 = vpack.c.bf16 %v494_v20, %v493_v16  ;;  %v440_v23 = vpack.c.bf16 %v502_v21, %v501_v17 }
 0x103   :  { %v206_v24 = vpop.f32.mrf.mxu0  ;;  %v238_v25 = vpop.f32.mrf.mxu1 }
 0x104   :  { %452 = vst [vmem:[#allocation7 + $0x8] sm:$0xff] %v420_v22   ;;  %456 = vst [vmem:[#allocation7 + $0x28] sm:$0xff] %v440_v23   ;;  %v415_v26 = vpack.c.bf16 %v206_v24, %v203_v18  ;;  %v435_v27 = vpack.c.bf16 %v238_v25, %v235_v19 }
 0x105   :  { %v497_v28 = vpop.f32.mrf.mxu0  ;;  %v505_v29 = vpop.f32.mrf.mxu1 }
 0x106   :  { %416 = vst [vmem:[#allocation7] sm:$0xff] %v415_v26   ;;  %455 = vst [vmem:[#allocation7 + $0x20] sm:$0xff] %v435_v27  }
 0x107   :  { %v219_v30 = vpop.f32.mrf.mxu0  ;;  %v251_v31 = vpop.f32.mrf.mxu1 }
 0x109   :  { %v498_v32 = vpop.f32.mrf.mxu0  ;;  %v506_v33 = vpop.f32.mrf.mxu1 }
 0x10a   :  { %v430_v34 = vpack.c.bf16 %v498_v32, %v497_v28  ;;  %v450_v35 = vpack.c.bf16 %v506_v33, %v505_v29 }
 0x10b   :  { %v222_v36 = vpop.f32.mrf.mxu0  ;;  %v254_v37 = vpop.f32.mrf.mxu1 }
 0x10c   :  { %454 = vst [vmem:[#allocation7 + $0x18] sm:$0xff] %v430_v34   ;;  %458 = vst [vmem:[#allocation7 + $0x38] sm:$0xff] %v450_v35   ;;  %v425_v38 = vpack.c.bf16 %v222_v36, %v219_v30  ;;  %v445_v39 = vpack.c.bf16 %v254_v37, %v251_v31 }
 0x10e   :  { %453 = vst [vmem:[#allocation7 + $0x10] sm:$0xff] %v425_v38   ;;  %457 = vst [vmem:[#allocation7 + $0x30] sm:$0xff] %v445_v39  }
 0x10f   :  { %595 = shalt.err (!%p592_p0)
}
 0x110   :  { %357 = dma.vmem_to_hbm [thread:$0]  %s352_s1, 1024, %s650_s2, [#allocation4], %s611_s12, %s611_s12, %s612_s13  }
 0x111   :  { %608 = dma.done.wait [#allocation4], 1024  }
 0x112   :  { %609 = vsyncadd [#allocation4], 4294966272 }
 0x113   :  { %361 = vsyncpa [#allocation3], 1 }
 0x114   :  { %362 = vsyncpa [#allocation6], 1 }
 0x115   :  { %363 = vsyncpa [#allocation4], 1 }

</bundles_post_ra>
